<compile_context>
chip_gen: v7x
topology: tpu7x:2x2x1
jax: 0.10.0
libtpu: 0.0.40
codegen_flags: <defaults>
</compile_context>

<pallas_src>
import jax
import jax.numpy as jnp
from jax.experimental import pallas as pl
from jax.experimental.pallas import tpu as pltpu


# ----------------------------------------------------------------------------
# Pallas kernel: accumulate D = (Fo - Ft) @ (Fo + Ft).T over M tiles, per frame.
# Inputs are (T, Np, Mp) bf16; grid = (T, Mp // tk); output (T, Np, Np) f32.
# ----------------------------------------------------------------------------
def _diff_gram_kernel(fo_ref, ft_ref, d_ref):
    @pl.when(pl.program_id(1) == 0)
    def _init():
        d_ref[...] = jnp.zeros_like(d_ref)

    fo = fo_ref[...]                      # (Np, tk) bf16
    ft = ft_ref[...]
    dn = (((1,), (1,)), ((), ()))         # contract over M (lane axis): A @ B.T
    d_ref[...] += jax.lax.dot_general(fo - ft, fo + ft, dn,
                                      preferred_element_type=jnp.float32)


def _round_up(x, m):
    return ((x + m - 1) // m) * m


def _choose_tk(Np, Mp, max_tk=2048, vmem_budget=24 * 1024 * 1024):
    """K tile: multiple of 128 that divides Mp; double-buffered bf16 inputs plus
    the resident (double-buffered) f32 output must fit the VMEM budget."""
    out_bytes = 2 * Np * Np * 4                  # resident f32 output block (x2 bufs)
    tk = (min(max_tk, Mp) // 128) * 128
    while tk > 128 and out_bytes + 4 * Np * tk * 2 > vmem_budget:
        tk -= 128                                # 2 inputs x 2 buffers x bf16
    while Mp % tk != 0:                          # Mp is a multiple of 128 -> terminates
        tk -= 128
    return tk


def diff_gram(fo, ft):
    """fo, ft: (T, N, M) float.  Returns (T, Np, Np) f32 with
    D_t = (Fo_t - Ft_t) @ (Fo_t + Ft_t).T (rows/cols beyond N are exactly zero)."""
    T, N, M = fo.shape
    Np = _round_up(N, 16)        # bf16 sublane packing
    Mp = _round_up(M, 128)       # lane width
    tk = _choose_tk(Np, Mp)

    # Single fused cast+pad pass.  Zero padding contributes zero products.
    pad = ((0, 0), (0, Np - N), (0, Mp - M))
    fo_p = jnp.pad(fo.astype(jnp.bfloat16), pad)
    ft_p = jnp.pad(ft.astype(jnp.bfloat16), pad)

    return pl.pallas_call(
        _diff_gram_kernel,
        out_shape=jax.ShapeDtypeStruct((T, Np, Np), jnp.float32),
        grid_spec=pltpu.PrefetchScalarGridSpec(
            num_scalar_prefetch=0,
            grid=(T, Mp // tk),
            in_specs=[
                pl.BlockSpec((None, Np, tk), lambda b, k: (b, 0, k)),
                pl.BlockSpec((None, Np, tk), lambda b, k: (b, 0, k)),
            ],
            out_specs=pl.BlockSpec((None, Np, Np), lambda b, k: (b, 0, 0)),
        ),
        compiler_params=pltpu.CompilerParams(
            dimension_semantics=("parallel", "arbitrary"),
            vmem_limit_bytes=48 * 1024 * 1024),
    )(fo_p, ft_p)


def gram_l1_sums(fo, ft):
    """(T,) f32 of sum|Fo@Fo.T - Ft@Ft.T| per frame (unnormalized grams)."""
    D = diff_gram(fo, ft)                           # Pallas kernel
    g_diff = 0.5 * (D + jnp.swapaxes(D, 1, 2))      # = Go - Gt (symmetric, exact id.)
    return jnp.sum(jnp.abs(g_diff), axis=(1, 2))


# ----------------------------------------------------------------------------
# Synthetic deterministic "VGG" feature extractor (plain JAX glue), NCHW.
# Returns relu2_2 / relu3_3 / relu4_3 analogues.
# ----------------------------------------------------------------------------
_VGG_CHANNELS = [(3, 8), (8, 8),        # block1 (then pool)
                 (8, 16), (16, 16),     # block2 -> relu2_2 (then pool)
                 (16, 32), (32, 32),    # block3 -> relu3_3 (then pool)
                 (32, 64), (64, 64)]    # block4 -> relu4_3


def make_vgg_params(key):
    params = []
    keys = jax.random.split(key, len(_VGG_CHANNELS))
    for k, (cin, cout) in zip(keys, _VGG_CHANNELS):
        scale = 0.3 / jnp.sqrt(jnp.float32(cin * 9))
        w = scale * jax.random.normal(k, (cout, cin, 3, 3), jnp.float32)  # OIHW
        b = jnp.zeros((cout,), jnp.float32)
        params.append((w, b))
    return params


def _conv_relu(x, w, b):
    y = jax.lax.conv_general_dilated(
        x, w, window_strides=(1, 1), padding="SAME",
        dimension_numbers=("NCHW", "OIHW", "NCHW"))
    return jax.nn.relu(y + b[None, :, None, None])


def _maxpool2(x):
    return jax.lax.reduce_window(
        x, -jnp.inf, jax.lax.max, (1, 1, 2, 2), (1, 1, 2, 2), "VALID")


def vgg_features(x, params):
    """x: (N, 3, H, W) NCHW.  Returns dict with relu2_2 / relu3_3 / relu4_3."""
    p = iter(params)
    h = _conv_relu(x, *next(p))
    h = _conv_relu(h, *next(p))
    h = _maxpool2(h)
    h = _conv_relu(h, *next(p))
    h = _conv_relu(h, *next(p))
    relu2_2 = h
    h = _maxpool2(h)
    h = _conv_relu(h, *next(p))
    h = _conv_relu(h, *next(p))
    relu3_3 = h
    h = _maxpool2(h)
    h = _conv_relu(h, *next(p))
    h = _conv_relu(h, *next(p))
    relu4_3 = h
    return {"relu2_2": relu2_2, "relu3_3": relu3_3, "relu4_3": relu4_3}


# ----------------------------------------------------------------------------
# StyleLoss forward (original_channel_norm=True).
# targets, outputs: (B, 1, H, W, T)  ->  scalar (mean over frames).
# ----------------------------------------------------------------------------
@jax.jit
def style_loss_forward(targets, outputs, vgg_params):
    B, C_in, H, W, T = targets.shape

    def to_frames(x):                                  # (B,1,H,W,T) -> (T*B,3,H,W)
        x = jnp.transpose(x, (4, 0, 1, 2, 3)).reshape(T * B, C_in, H, W)
        return jnp.tile(x, (1, 3, 1, 1))               # .repeat(1, 3, 1, 1)

    # One conv pass for outputs + targets of all T frames (single conv batch).
    both = jnp.concatenate([to_frames(outputs), to_frames(targets)], axis=0)
    feats = vgg_features(both, vgg_params)

    layers = ["relu2_2", "relu3_3", "relu4_3"]
    per_frame = jnp.zeros((T,), jnp.float32)
    for i, layer in enumerate(layers):
        f = feats[layer]                               # (2*T*B, C, Hf, Wf)
        _, C, Hf, Wf = f.shape
        N, M = B * C, Hf * Wf
        fo = f[: T * B].reshape(T, N, M)               # per-frame view(a*b, c*d)
        ft = f[T * B:].reshape(T, N, M)
        abs_sums = gram_l1_sums(fo, ft)                # Pallas kernel path: (T,)
        gram_div = jnp.float32(N * M)                  # G.div(a*b*c*d)
        l1 = (abs_sums / gram_div) / jnp.float32(N * N)       # nn.L1Loss() mean
        per_frame = per_frame + l1 / jnp.float32(2 ** (i + 1))  # original_channel_norm
    return jnp.mean(per_frame)                         # mean over frames


# ----------------------------------------------------------------------------
if __name__ == "__main__":
    key = jax.random.PRNGKey(0)
    k_params, k_t, k_o = jax.random.split(key, 3)

    vgg_params = make_vgg_params(k_params)

    B, C, H, W, T = 2, 1, 16, 16, 2
    targets = jax.random.normal(k_t, (B, C, H, W, T), jnp.float32)
    outputs = jax.random.normal(k_o, (B, C, H, W, T), jnp.float32)

    loss = style_loss_forward(targets, outputs, vgg_params)
    jax.block_until_ready(loss)
    assert loss.shape == () and bool(jnp.isfinite(loss))
    print("KERNEL_OK")
</pallas_src>

<mosaic_0001>
module attributes {stable_mosaic.version = 11 : i64} {
  func.func @_diff_gram_kernel(%arg0: i32, %arg1: i32, %arg2: memref<1x64x128xbf16, #tpu.memory_space<vmem>>, %arg3: memref<1x64x128xbf16, #tpu.memory_space<vmem>>, %arg4: memref<1x64x64xf32, #tpu.memory_space<vmem>>) attributes {dimension_semantics = [#tpu.dimension_semantics<parallel>, #tpu.dimension_semantics<arbitrary>], iteration_bounds = array<i64: 2, 1>, scalar_prefetch = 0 : i64, scratch_operands = 0 : i64, tpu.core_type = #tpu.core_type<tc>, window_params = [{transform_indices = @transform_0, window_bounds = array<i64: 1, 64, 128>}, {transform_indices = @transform_1, window_bounds = array<i64: 1, 64, 128>}, {transform_indices = @transform_2, window_bounds = array<i64: 1, 64, 64>}]} {
    %c0_i32 = arith.constant 0 : i32
    %0 = arith.cmpi eq, %arg1, %c0_i32 : i32
    %1 = arith.extui %0 : i1 to i32
    %c0_i32_0 = arith.constant 0 : i32
    %2 = arith.cmpi ne, %1, %c0_i32_0 : i32
    scf.if %2 {
      %cst_12 = arith.constant 0.000000e+00 : f32
      %16 = vector.broadcast %cst_12 : f32 to vector<64x64xf32>
      %c0_13 = arith.constant 0 : index
      %c0_14 = arith.constant 0 : index
      %c0_15 = arith.constant 0 : index
      %17 = vector.load %arg4[%c0_13, %c0_14, %c0_15] : memref<1x64x64xf32, #tpu.memory_space<vmem>>, vector<1x64x64xf32>
      %18 = vector.shape_cast %17 : vector<1x64x64xf32> to vector<64x64xf32>
      %19 = vector.shape_cast %16 : vector<64x64xf32> to vector<1x64x64xf32>
      tpu.vector_store %arg4[%c0_13, %c0_14, %c0_15], %19 {strides = array<i32>} : memref<1x64x64xf32, #tpu.memory_space<vmem>>, vector<1x64x64xf32>,
    } else {
    }
    %c0 = arith.constant 0 : index
    %c0_1 = arith.constant 0 : index
    %c0_2 = arith.constant 0 : index
    %3 = vector.load %arg2[%c0, %c0_1, %c0_2] : memref<1x64x128xbf16, #tpu.memory_space<vmem>>, vector<1x64x128xbf16>
    %4 = vector.shape_cast %3 : vector<1x64x128xbf16> to vector<64x128xbf16>
    %c0_3 = arith.constant 0 : index
    %c0_4 = arith.constant 0 : index
    %c0_5 = arith.constant 0 : index
    %5 = vector.load %arg3[%c0_3, %c0_4, %c0_5] : memref<1x64x128xbf16, #tpu.memory_space<vmem>>, vector<1x64x128xbf16>
    %6 = vector.shape_cast %5 : vector<1x64x128xbf16> to vector<64x128xbf16>
    %c0_6 = arith.constant 0 : index
    %c0_7 = arith.constant 0 : index
    %c0_8 = arith.constant 0 : index
    %7 = vector.load %arg4[%c0_6, %c0_7, %c0_8] : memref<1x64x64xf32, #tpu.memory_space<vmem>>, vector<1x64x64xf32>
    %8 = vector.shape_cast %7 : vector<1x64x64xf32> to vector<64x64xf32>
    %9 = arith.subf %4, %6 : vector<64x128xbf16>
    %10 = arith.addf %4, %6 : vector<64x128xbf16>
    %cst = arith.constant dense<0.000000e+00> : vector<64x64xf32>
    %11 = tpu.matmul %9, %10, %cst {dimension_numbers = #tpu.dot_dimension_numbers<[1], [1], [0], [0], [0, 0, 1, 0], [], []>} : vector<64x128xbf16>, vector<64x128xbf16>, vector<64x64xf32> -> vector<64x64xf32>
    %12 = arith.addf %8, %11 : vector<64x64xf32>
    %c0_9 = arith.constant 0 : index
    %c0_10 = arith.constant 0 : index
    %c0_11 = arith.constant 0 : index
    %13 = vector.load %arg4[%c0_9, %c0_10, %c0_11] : memref<1x64x64xf32, #tpu.memory_space<vmem>>, vector<1x64x64xf32>
    %14 = vector.shape_cast %13 : vector<1x64x64xf32> to vector<64x64xf32>
    %15 = vector.shape_cast %12 : vector<64x64xf32> to vector<1x64x64xf32>
    tpu.vector_store %arg4[%c0_9, %c0_10, %c0_11], %15 {strides = array<i32>} : memref<1x64x64xf32, #tpu.memory_space<vmem>>, vector<1x64x64xf32>,
    return
  }
  func.func @transform_0(%arg0: i32, %arg1: i32) -> (i32, i32, i32) {
    %c0_i32 = arith.constant 0 : i32
    %c0_i32_0 = arith.constant 0 : i32
    return %arg0, %c0_i32, %arg1 : i32, i32, i32
  }
  func.func @transform_1(%arg0: i32, %arg1: i32) -> (i32, i32, i32) {
    %c0_i32 = arith.constant 0 : i32
    %c0_i32_0 = arith.constant 0 : i32
    return %arg0, %c0_i32, %arg1 : i32, i32, i32
  }
  func.func @transform_2(%arg0: i32, %arg1: i32) -> (i32, i32, i32) {
    %c0_i32 = arith.constant 0 : i32
    %c0_i32_0 = arith.constant 0 : i32
    %c0_i32_1 = arith.constant 0 : i32
    return %arg0, %c0_i32, %c0_i32_0 : i32, i32, i32
  }
}

module attributes {stable_mosaic.version = 11 : i64} {
  func.func @_diff_gram_kernel(%arg0: i32, %arg1: i32, %arg2: memref<1x128x128xbf16, #tpu.memory_space<vmem>>, %arg3: memref<1x128x128xbf16, #tpu.memory_space<vmem>>, %arg4: memref<1x128x128xf32, #tpu.memory_space<vmem>>) attributes {dimension_semantics = [#tpu.dimension_semantics<parallel>, #tpu.dimension_semantics<arbitrary>], iteration_bounds = array<i64: 2, 1>, scalar_prefetch = 0 : i64, scratch_operands = 0 : i64, tpu.core_type = #tpu.core_type<tc>, window_params = [{transform_indices = @transform_0, window_bounds = array<i64: 1, 128, 128>}, {transform_indices = @transform_1, window_bounds = array<i64: 1, 128, 128>}, {transform_indices = @transform_2, window_bounds = array<i64: 1, 128, 128>}]} {
    %c0_i32 = arith.constant 0 : i32
    %0 = arith.cmpi eq, %arg1, %c0_i32 : i32
    %1 = arith.extui %0 : i1 to i32
    %c0_i32_0 = arith.constant 0 : i32
    %2 = arith.cmpi ne, %1, %c0_i32_0 : i32
    scf.if %2 {
      %cst_12 = arith.constant 0.000000e+00 : f32
      %16 = vector.broadcast %cst_12 : f32 to vector<128x128xf32>
      %c0_13 = arith.constant 0 : index
      %c0_14 = arith.constant 0 : index
      %c0_15 = arith.constant 0 : index
      %17 = vector.load %arg4[%c0_13, %c0_14, %c0_15] : memref<1x128x128xf32, #tpu.memory_space<vmem>>, vector<1x128x128xf32>
      %18 = vector.shape_cast %17 : vector<1x128x128xf32> to vector<128x128xf32>
      %19 = vector.shape_cast %16 : vector<128x128xf32> to vector<1x128x128xf32>
      tpu.vector_store %arg4[%c0_13, %c0_14, %c0_15], %19 {strides = array<i32>} : memref<1x128x128xf32, #tpu.memory_space<vmem>>, vector<1x128x128xf32>,
    } else {
    }
    %c0 = arith.constant 0 : index
    %c0_1 = arith.constant 0 : index
    %c0_2 = arith.constant 0 : index
    %3 = vector.load %arg2[%c0, %c0_1, %c0_2] : memref<1x128x128xbf16, #tpu.memory_space<vmem>>, vector<1x128x128xbf16>
    %4 = vector.shape_cast %3 : vector<1x128x128xbf16> to vector<128x128xbf16>
    %c0_3 = arith.constant 0 : index
    %c0_4 = arith.constant 0 : index
    %c0_5 = arith.constant 0 : index
    %5 = vector.load %arg3[%c0_3, %c0_4, %c0_5] : memref<1x128x128xbf16, #tpu.memory_space<vmem>>, vector<1x128x128xbf16>
    %6 = vector.shape_cast %5 : vector<1x128x128xbf16> to vector<128x128xbf16>
    %c0_6 = arith.constant 0 : index
    %c0_7 = arith.constant 0 : index
    %c0_8 = arith.constant 0 : index
    %7 = vector.load %arg4[%c0_6, %c0_7, %c0_8] : memref<1x128x128xf32, #tpu.memory_space<vmem>>, vector<1x128x128xf32>
    %8 = vector.shape_cast %7 : vector<1x128x128xf32> to vector<128x128xf32>
    %9 = arith.subf %4, %6 : vector<128x128xbf16>
    %10 = arith.addf %4, %6 : vector<128x128xbf16>
    %cst = arith.constant dense<0.000000e+00> : vector<128x128xf32>
    %11 = tpu.matmul %9, %10, %cst {dimension_numbers = #tpu.dot_dimension_numbers<[1], [1], [0], [0], [0, 0, 1, 0], [], []>} : vector<128x128xbf16>, vector<128x128xbf16>, vector<128x128xf32> -> vector<128x128xf32>
    %12 = arith.addf %8, %11 : vector<128x128xf32>
    %c0_9 = arith.constant 0 : index
    %c0_10 = arith.constant 0 : index
    %c0_11 = arith.constant 0 : index
    %13 = vector.load %arg4[%c0_9, %c0_10, %c0_11] : memref<1x128x128xf32, #tpu.memory_space<vmem>>, vector<1x128x128xf32>
    %14 = vector.shape_cast %13 : vector<1x128x128xf32> to vector<128x128xf32>
    %15 = vector.shape_cast %12 : vector<128x128xf32> to vector<1x128x128xf32>
    tpu.vector_store %arg4[%c0_9, %c0_10, %c0_11], %15 {strides = array<i32>} : memref<1x128x128xf32, #tpu.memory_space<vmem>>, vector<1x128x128xf32>,
    return
  }
  func.func @transform_0(%arg0: i32, %arg1: i32) -> (i32, i32, i32) {
    %c0_i32 = arith.constant 0 : i32
    %c0_i32_0 = arith.constant 0 : i32
    return %arg0, %c0_i32, %arg1 : i32, i32, i32
  }
  func.func @transform_1(%arg0: i32, %arg1: i32) -> (i32, i32, i32) {
    %c0_i32 = arith.constant 0 : i32
    %c0_i32_0 = arith.constant 0 : i32
    return %arg0, %c0_i32, %arg1 : i32, i32, i32
  }
  func.func @transform_2(%arg0: i32, %arg1: i32) -> (i32, i32, i32) {
    %c0_i32 = arith.constant 0 : i32
    %c0_i32_0 = arith.constant 0 : i32
    %c0_i32_1 = arith.constant 0 : i32
    return %arg0, %c0_i32, %c0_i32_0 : i32, i32, i32
  }
}

module attributes {stable_mosaic.version = 11 : i64} {
  func.func @_diff_gram_kernel(%arg0: i32, %arg1: i32, %arg2: memref<1x32x128xbf16, #tpu.memory_space<vmem>>, %arg3: memref<1x32x128xbf16, #tpu.memory_space<vmem>>, %arg4: memref<1x32x32xf32, #tpu.memory_space<vmem>>) attributes {dimension_semantics = [#tpu.dimension_semantics<parallel>, #tpu.dimension_semantics<arbitrary>], iteration_bounds = array<i64: 2, 1>, scalar_prefetch = 0 : i64, scratch_operands = 0 : i64, tpu.core_type = #tpu.core_type<tc>, window_params = [{transform_indices = @transform_0, window_bounds = array<i64: 1, 32, 128>}, {transform_indices = @transform_1, window_bounds = array<i64: 1, 32, 128>}, {transform_indices = @transform_2, window_bounds = array<i64: 1, 32, 32>}]} {
    %c0_i32 = arith.constant 0 : i32
    %0 = arith.cmpi eq, %arg1, %c0_i32 : i32
    %1 = arith.extui %0 : i1 to i32
    %c0_i32_0 = arith.constant 0 : i32
    %2 = arith.cmpi ne, %1, %c0_i32_0 : i32
    scf.if %2 {
      %cst_12 = arith.constant 0.000000e+00 : f32
      %16 = vector.broadcast %cst_12 : f32 to vector<32x32xf32>
      %c0_13 = arith.constant 0 : index
      %c0_14 = arith.constant 0 : index
      %c0_15 = arith.constant 0 : index
      %17 = vector.load %arg4[%c0_13, %c0_14, %c0_15] : memref<1x32x32xf32, #tpu.memory_space<vmem>>, vector<1x32x32xf32>
      %18 = vector.shape_cast %17 : vector<1x32x32xf32> to vector<32x32xf32>
      %19 = vector.shape_cast %16 : vector<32x32xf32> to vector<1x32x32xf32>
      tpu.vector_store %arg4[%c0_13, %c0_14, %c0_15], %19 {strides = array<i32>} : memref<1x32x32xf32, #tpu.memory_space<vmem>>, vector<1x32x32xf32>,
    } else {
    }
    %c0 = arith.constant 0 : index
    %c0_1 = arith.constant 0 : index
    %c0_2 = arith.constant 0 : index
    %3 = vector.load %arg2[%c0, %c0_1, %c0_2] : memref<1x32x128xbf16, #tpu.memory_space<vmem>>, vector<1x32x128xbf16>
    %4 = vector.shape_cast %3 : vector<1x32x128xbf16> to vector<32x128xbf16>
    %c0_3 = arith.constant 0 : index
    %c0_4 = arith.constant 0 : index
    %c0_5 = arith.constant 0 : index
    %5 = vector.load %arg3[%c0_3, %c0_4, %c0_5] : memref<1x32x128xbf16, #tpu.memory_space<vmem>>, vector<1x32x128xbf16>
    %6 = vector.shape_cast %5 : vector<1x32x128xbf16> to vector<32x128xbf16>
    %c0_6 = arith.constant 0 : index
    %c0_7 = arith.constant 0 : index
    %c0_8 = arith.constant 0 : index
    %7 = vector.load %arg4[%c0_6, %c0_7, %c0_8] : memref<1x32x32xf32, #tpu.memory_space<vmem>>, vector<1x32x32xf32>
    %8 = vector.shape_cast %7 : vector<1x32x32xf32> to vector<32x32xf32>
    %9 = arith.subf %4, %6 : vector<32x128xbf16>
    %10 = arith.addf %4, %6 : vector<32x128xbf16>
    %cst = arith.constant dense<0.000000e+00> : vector<32x32xf32>
    %11 = tpu.matmul %9, %10, %cst {dimension_numbers = #tpu.dot_dimension_numbers<[1], [1], [0], [0], [0, 0, 1, 0], [], []>} : vector<32x128xbf16>, vector<32x128xbf16>, vector<32x32xf32> -> vector<32x32xf32>
    %12 = arith.addf %8, %11 : vector<32x32xf32>
    %c0_9 = arith.constant 0 : index
    %c0_10 = arith.constant 0 : index
    %c0_11 = arith.constant 0 : index
    %13 = vector.load %arg4[%c0_9, %c0_10, %c0_11] : memref<1x32x32xf32, #tpu.memory_space<vmem>>, vector<1x32x32xf32>
    %14 = vector.shape_cast %13 : vector<1x32x32xf32> to vector<32x32xf32>
    %15 = vector.shape_cast %12 : vector<32x32xf32> to vector<1x32x32xf32>
    tpu.vector_store %arg4[%c0_9, %c0_10, %c0_11], %15 {strides = array<i32>} : memref<1x32x32xf32, #tpu.memory_space<vmem>>, vector<1x32x32xf32>,
    return
  }
  func.func @transform_0(%arg0: i32, %arg1: i32) -> (i32, i32, i32) {
    %c0_i32 = arith.constant 0 : i32
    %c0_i32_0 = arith.constant 0 : i32
    return %arg0, %c0_i32, %arg1 : i32, i32, i32
  }
  func.func @transform_1(%arg0: i32, %arg1: i32) -> (i32, i32, i32) {
    %c0_i32 = arith.constant 0 : i32
    %c0_i32_0 = arith.constant 0 : i32
    return %arg0, %c0_i32, %arg1 : i32, i32, i32
  }
  func.func @transform_2(%arg0: i32, %arg1: i32) -> (i32, i32, i32) {
    %c0_i32 = arith.constant 0 : i32
    %c0_i32_0 = arith.constant 0 : i32
    %c0_i32_1 = arith.constant 0 : i32
    return %arg0, %c0_i32, %c0_i32_0 : i32, i32, i32
  }
}

</mosaic_0001>

<bundles_post_ra>
// kernel: style_loss_forward.4
= control target key start
LH: loop header
LB: loop body
LE: loop exit
PB: predicated region body
PF: predicated region fallthrough
CT: control target
= control target key end

     0   :  { %s590_s9 = smov 0   ;;  %s592_s10 = smov 0   ;;  %s688_s0 = inlined_call_operand.vmem [shape: bf16[2,64,128], index: 0, kind: input, shape index: {}]   ;;  %s689_s1 = inlined_call_operand.vmem [shape: bf16[2,64,128], index: 1, kind: input, shape index: {}]   ;;  %s690_s2 = inlined_call_operand.vmem [shape: f32[2,64,64], index: 2, kind: output, shape index: {}]  }
   0x1   :  { %s594_s11 = smov 0  }
   0x2 LB: > { %s24_s12 = sadd.s32 1, %s568_s10  ;;  %p473_p0 = scmp.ge.s32.totalorder %s572_s11, 1  ;;  %s572_s11 = sphi %s594_s11, %s12_s11   ;;  %s568_s10 = sphi %s592_s10, %s692_s10   ;;  %s564_s9 = sphi %s590_s9, %s691_s9  }
   0x3   : > { %p26_p1 = scmp.ge.s32.totalorder %s24_s12, 2  ;;  %p144_p2 = scmp.lt.s32.totalorder %s572_s11, 3 }
   0x5   : > { %s694_s12 = smov (%p26_p1, %s24_s12), 0  ;;  %p145_p3 = pnand %p473_p0, %p144_p2 }
   0x6   : > { %p177_p4 = scmp.lt.s32.totalorder (!%p145_p3), %s564_s9, 1  ;;  %vm203_vm0 = vcmask (!%p145_p3), 523264   ;;  %v574_v8 = vmov (!%p145_p3), 0.0  }
   0x7   : > { %148 = sbr.rel (%p145_p3) target bundleno = 273 (0x111), region = 28 }
   0xe   : > { %s696_s9 = smov (!%p177_p4, %s564_s9), 1 }
   0xf   : > { %s490_s13 = sshll.u32 %s696_s9, 5  ;;  %s492_s14 = sshll.u32 %s696_s9, 6 }
  0x10   : > { %s611_s17 = scalar_lea.vmem %s688_s0, %s490_s13  ;;  %s616_s20 = scalar_lea.vmem %s689_s1, %s490_s13 }
  0x11   : > { %s621_s23 = scalar_lea.vmem %s690_s2, %s492_s14  ;;  %v212_v0 = vld [vmem:[%s611_s17] sm:$0xf]  ;;  %v213_v1 = vld [vmem:[%s611_s17 + $0x4] sm:$0xf]  ;;  %v214_v5 = vld [vmem:[%s611_s17 + $0x8] sm:$0xf] }
  0x12   : > { %v220_v2 = vld [vmem:[%s616_s20] sm:$0xf]  ;;  %v221_v3 = vld [vmem:[%s616_s20 + $0x4] sm:$0xf]  ;;  %v215_v6 = vld [vmem:[%s611_s17 + $0xc] sm:$0xf] }
  0x13   : > { %v244_v4 = vadd.bf16 %v220_v2, %v212_v0  ;;  %v236_v7 = vsub.bf16 %v212_v0, %v220_v2  ;;  %206 = vst.msk [vmem:[%s621_s23 + $0x10] sm:$0xff] %vm203_vm0, %v574_v8  ;;  %204 = vst.msk [vmem:[%s621_s23] sm:$0xff] %vm203_vm0, %v574_v8  ;;  %v245_v9 = vadd.bf16 %v221_v3, %v213_v1  ;;  %v222_v10 = vld [vmem:[%s616_s20 + $0x8] sm:$0xf]  ;;  %v223_v11 = vld [vmem:[%s616_s20 + $0xc] sm:$0xf] }
  0x14   : > { %205 = vst.msk [vmem:[%s621_s23 + $0x8] sm:$0xff] %vm203_vm0, %v574_v8  ;;  %207 = vst.msk [vmem:[%s621_s23 + $0x18] sm:$0xff] %vm203_vm0, %v574_v8  ;;  %v237_v12 = vsub.bf16 %v213_v1, %v221_v3  ;;  %v246_v13 = vadd.bf16 %v222_v10, %v214_v5  ;;  %v247_v14 = vadd.bf16 %v223_v11, %v215_v6  ;;  %v216_v15 = vld [vmem:[%s611_s17 + $0x10] sm:$0xf]  ;;  %v217_v17 = vld [vmem:[%s611_s17 + $0x14] sm:$0xf] }
  0x15   : > { %208 = vst.msk [vmem:[%s621_s23 + $0x20] sm:$0xff] %vm203_vm0, %v574_v8  ;;  %209 = vst.msk [vmem:[%s621_s23 + $0x28] sm:$0xff] %vm203_vm0, %v574_v8  ;;  %v484_v16 = vcombine.low %v244_v4, %v245_v9  ;;  %v224_v18 = vld [vmem:[%s616_s20 + $0x10] sm:$0xf]  ;;  %v225_v19 = vld [vmem:[%s616_s20 + $0x14] sm:$0xf]  ;;  %v238_v35 = vsub.bf16 %v214_v5, %v222_v10  ;;  %v239_v36 = vsub.bf16 %v215_v6, %v223_v11 }
  0x16   : > { %210 = vst.msk [vmem:[%s621_s23 + $0x30] sm:$0xff] %vm203_vm0, %v574_v8  ;;  %211 = vst.msk [vmem:[%s621_s23 + $0x38] sm:$0xff] %vm203_vm0, %v574_v8  ;;  %v485_v20 = vcombine.low %v246_v13, %v247_v14  ;;  %v480_v21 = vcombine.low %v236_v7, %v237_v12  ;;  %v240_v22 = vsub.bf16 %v216_v15, %v224_v18  ;;  %v218_v28 = vld [vmem:[%s611_s17 + $0x18] sm:$0xf]  ;;  %v219_v29 = vld [vmem:[%s611_s17 + $0x1c] sm:$0xf] }
  0x17   : > { %v241_v23 = vsub.bf16 %v217_v17, %v225_v19  ;;  %501 = vmatprep.subr.bf16.mxu0 %v484_v16  ;;  %517 = vmatprep.subr.bf16.mxu1 %v484_v16  ;;  %v248_v25 = vadd.bf16 %v224_v18, %v216_v15  ;;  %v249_v26 = vadd.bf16 %v225_v19, %v217_v17  ;;  %v226_v30 = vld [vmem:[%s616_s20 + $0x18] sm:$0xf]  ;;  %v227_v31 = vld [vmem:[%s616_s20 + $0x1c] sm:$0xf] }
  0x18   : > { %502 = vmatpush3.bf16.xpose.msra.mxu0 %v484_v16  ;;  %521 = vmatpush3.bf16.xpose.msra.mxu1 %v484_v16  ;;  %v250_v32 = vadd.bf16 %v226_v30, %v218_v28  ;;  %v251_v33 = vadd.bf16 %v227_v31, %v219_v29  ;;  %v242_v37 = vsub.bf16 %v218_v28, %v226_v30 }
  0x19   : > { %v482_v24 = vcombine.low %v240_v22, %v241_v23  ;;  %503 = vmatprep.subr.bf16.mxu0 %v485_v20  ;;  %518 = vmatprep.subr.bf16.mxu1 %v485_v20  ;;  %v486_v27 = vcombine.low %v248_v25, %v249_v26  ;;  %v243_v38 = vsub.bf16 %v219_v29, %v227_v31 }
  0x1a   : > { %509 = vmatprep.mubr.bf16.mxu0 %v480_v21  ;;  %v487_v34 = vcombine.low %v250_v32, %v251_v33  ;;  %v481_v39 = vcombine.low %v238_v35, %v239_v36  ;;  %v230_v41 = vld [vmem:[%s621_s23 + $0x10] sm:$0xff]  ;;  %v228_v43 = vld [vmem:[%s621_s23] sm:$0xff] }
  0x1b   : > { %513 = vmatprep.mubr.bf16.mxu1 %v482_v24  ;;  %v483_v40 = vcombine.low %v242_v37, %v243_v38  ;;  %v231_v47 = vld [vmem:[%s621_s23 + $0x18] sm:$0xff]  ;;  %v229_v53 = vld [vmem:[%s621_s23 + $0x8] sm:$0xff] }
  0x1c   : > { %v232_v44 = vld [vmem:[%s621_s23 + $0x20] sm:$0xff]  ;;  %v233_v54 = vld [vmem:[%s621_s23 + $0x28] sm:$0xff] }
  0x1d   : > { %v234_v42 = vld [vmem:[%s621_s23 + $0x30] sm:$0xff]  ;;  %v235_v48 = vld [vmem:[%s621_s23 + $0x38] sm:$0xff] }
  0x20   : > { %504 = vmatpush3.bf16.xpose.msra.mxu0 %v485_v20  ;;  %522 = vmatpush3.bf16.xpose.msra.mxu1 %v485_v20 }
  0x21   : > { %505 = vmatprep.subr.bf16.mxu0 %v486_v27  ;;  %519 = vmatprep.subr.bf16.mxu1 %v486_v27 }
  0x28   : > { %506 = vmatpush3.bf16.xpose.msra.mxu0 %v486_v27  ;;  %523 = vmatpush3.bf16.xpose.msra.mxu1 %v486_v27 }
  0x29   : > { %507 = vmatprep.subr.bf16.mxu0 %v487_v34  ;;  %520 = vmatprep.subr.bf16.mxu1 %v487_v34 }
  0x30   : > { %508 = vmatpush3.bf16.xpose.msra.mxu0 %v487_v34  ;;  %524 = vmatpush3.bf16.xpose.msra.mxu1 %v487_v34 }
  0x37   : > { %510 = vmatmul.mubr.bf16.vlgmr.msra.gmra.mrb[0].mxu0 %v481_v39  ;;  %514 = vmatmul.mubr.bf16.vlgmr.msra.gmra.mrb[0].mxu1 %v483_v40 }
 0x10a   : > { %v511_v45 = vpop.f32.mrb[0].mxu0  ;;  %v515_v46 = vpop.f32.mrb[0].mxu1 }
 0x10b   : > { %v367_v49 = vadd.f32 %v511_v45, %v230_v41  ;;  %v371_v50 = vadd.f32 %v515_v46, %v234_v42  ;;  %v334_v51 = vpop.f32.mrb[1].mxu0  ;;  %v350_v52 = vpop.f32.mrb[1].mxu1 }
 0x10c   : > { %v365_v55 = vadd.f32 %v334_v51, %v228_v43  ;;  %v369_v56 = vadd.f32 %v350_v52, %v232_v44  ;;  %v512_v57 = vpop.f32.mrb[2].mxu0  ;;  %v516_v58 = vpop.f32.mrb[2].mxu1 }
 0x10d   : > { %376 = vst.msk [vmem:[%s621_s23 + $0x10] sm:$0xff] %vm203_vm0, %v367_v49  ;;  %380 = vst.msk [vmem:[%s621_s23 + $0x30] sm:$0xff] %vm203_vm0, %v371_v50  ;;  %v368_v59 = vadd.f32 %v512_v57, %v231_v47  ;;  %v372_v60 = vadd.f32 %v516_v58, %v235_v48  ;;  %v337_v61 = vpop.f32.mrb[3].mxu0  ;;  %v353_v62 = vpop.f32.mrb[3].mxu1 }
 0x10e   : > { %374 = vst.msk [vmem:[%s621_s23] sm:$0xff] %vm203_vm0, %v365_v55  ;;  %378 = vst.msk [vmem:[%s621_s23 + $0x20] sm:$0xff] %vm203_vm0, %v369_v56  ;;  %v366_v63 = vadd.f32 %v337_v61, %v229_v53  ;;  %v370_v0 = vadd.f32 %v353_v62, %v233_v54 }
 0x10f   : > { %377 = vst.msk [vmem:[%s621_s23 + $0x18] sm:$0xff] %vm203_vm0, %v368_v59  ;;  %381 = vst.msk [vmem:[%s621_s23 + $0x38] sm:$0xff] %vm203_vm0, %v372_v60 }
 0x110   : > { %375 = vst.msk [vmem:[%s621_s23 + $0x8] sm:$0xff] %vm203_vm0, %v366_v63  ;;  %379 = vst.msk [vmem:[%s621_s23 + $0x28] sm:$0xff] %vm203_vm0, %v370_v0 }
 0x111 PF: > { %s12_s11 = sadd.s32 1, %s572_s11   ;;  %s691_s9 = smov %s568_s10 }
 0x112   : > { %p9_p5 = scmp.ge.s32.totalorder %s12_s11, 4   ;;  %s692_s10 = smov %s694_s12 }
 0x114   :  { %11 = sbr.rel (!%p9_p5) target bundleno = 2 (0x2), region = 65 }

// kernel: reverse.1
= control target key start
LH: loop header
LB: loop body
LE: loop exit
PB: predicated region body
PF: predicated region fallthrough
CT: control target
= control target key end

     0   :  { %v503_v3 = vmov 0.0   ;;  %s1018_s0 = inlined_call_operand.vmem [shape: f32[64,64,3,3], index: 0, kind: input, shape index: {}]   ;;  %s1019_s1 = inlined_call_operand.vmem [shape: bf16[64,64,3,3], index: 1, kind: output, shape index: {}]  }
   0x1   :  { %v360_v0 = vld [vmem:[%s1018_s0 + $0x200] sm:$0xff]  ;;  %v376_v19 = vld [vmem:[%s1018_s0 + $0x208] sm:$0xff]  ;;  %v394_v37 = vld [vmem:[%s1018_s0 + $0x210] sm:$0xff] }
   0x2   :  { %v361_v1 = vld [vmem:[%s1018_s0 + $0x140] sm:$0xff]  ;;  %v4_v4 = vpack.c.bf16 %v503_v3, %v360_v0  ;;  %v378_v20 = vld [vmem:[%s1018_s0 + $0x148] sm:$0xff]  ;;  %v48_v22 = vpack.c.bf16 %v503_v3, %v376_v19  ;;  %v396_v38 = vld [vmem:[%s1018_s0 + $0x150] sm:$0xff]  ;;  %v93_v40 = vpack.c.bf16 %v503_v3, %v394_v37 }
   0x3   :  { %v363_v2 = vld [vmem:[%s1018_s0 + $0x80] sm:$0xff]  ;;  %v9_v5 = vpack.c.bf16 %v503_v3, %v361_v1  ;;  %v380_v21 = vld [vmem:[%s1018_s0 + $0x88] sm:$0xff]  ;;  %v53_v23 = vpack.c.bf16 %v503_v3, %v378_v20  ;;  %v398_v39 = vld [vmem:[%s1018_s0 + $0x90] sm:$0xff]  ;;  %v98_v41 = vpack.c.bf16 %v503_v3, %v396_v38 }
   0x4   :  { %v14_v6 = vpack.c.bf16 %v503_v3, %v363_v2  ;;  %v365_v7 = vld [vmem:[%s1018_s0 + $0x1c0] sm:$0xff]  ;;  %5 = vst [vmem:[%s1019_s1] sm:$0xf] %v4_v4  ;;  %v58_v24 = vpack.c.bf16 %v503_v3, %v380_v21  ;;  %v382_v25 = vld [vmem:[%s1018_s0 + $0x1c8] sm:$0xff]  ;;  %377 = vst [vmem:[%s1019_s1 + $0x4] sm:$0xf] %v48_v22  ;;  %v103_v42 = vpack.c.bf16 %v503_v3, %v398_v39 }
   0x5   :  { %v367_v8 = vld [vmem:[%s1018_s0 + $0x100] sm:$0xff]  ;;  %v19_v10 = vpack.c.bf16 %v503_v3, %v365_v7  ;;  %362 = vst [vmem:[%s1019_s1 + $0x60] sm:$0xf] %v9_v5  ;;  %v384_v26 = vld [vmem:[%s1018_s0 + $0x108] sm:$0xff]  ;;  %v63_v28 = vpack.c.bf16 %v503_v3, %v382_v25  ;;  %379 = vst [vmem:[%s1019_s1 + $0x64] sm:$0xf] %v53_v23 }
   0x6   :  { %v369_v9 = vld [vmem:[%s1018_s0 + $0x40] sm:$0xff]  ;;  %v24_v11 = vpack.c.bf16 %v503_v3, %v367_v8  ;;  %364 = vst [vmem:[%s1019_s1 + $0xc0] sm:$0xf] %v14_v6  ;;  %v386_v27 = vld [vmem:[%s1018_s0 + $0x48] sm:$0xff]  ;;  %v68_v29 = vpack.c.bf16 %v503_v3, %v384_v26  ;;  %381 = vst [vmem:[%s1019_s1 + $0xc4] sm:$0xf] %v58_v24 }
   0x7   :  { %v29_v12 = vpack.c.bf16 %v503_v3, %v369_v9  ;;  %v371_v13 = vld [vmem:[%s1018_s0 + $0x180] sm:$0xff]  ;;  %366 = vst [vmem:[%s1019_s1 + $0x20] sm:$0xf] %v19_v10  ;;  %v73_v30 = vpack.c.bf16 %v503_v3, %v386_v27  ;;  %v388_v31 = vld [vmem:[%s1018_s0 + $0x188] sm:$0xff]  ;;  %383 = vst [vmem:[%s1019_s1 + $0x24] sm:$0xf] %v63_v28 }
   0x8   :  { %v373_v14 = vld [vmem:[%s1018_s0 + $0xc0] sm:$0xff]  ;;  %v34_v16 = vpack.c.bf16 %v503_v3, %v371_v13  ;;  %368 = vst [vmem:[%s1019_s1 + $0x80] sm:$0xf] %v24_v11  ;;  %v390_v32 = vld [vmem:[%s1018_s0 + $0xc8] sm:$0xff]  ;;  %v78_v34 = vpack.c.bf16 %v503_v3, %v388_v31  ;;  %385 = vst [vmem:[%s1019_s1 + $0x84] sm:$0xf] %v68_v29 }
   0x9   :  { %v41_v15 = vld [vmem:[%s1018_s0] sm:$0xff]  ;;  %v39_v17 = vpack.c.bf16 %v503_v3, %v373_v14  ;;  %370 = vst [vmem:[%s1019_s1 + $0xe0] sm:$0xf] %v29_v12  ;;  %v392_v33 = vld [vmem:[%s1018_s0 + $0x8] sm:$0xff]  ;;  %v83_v35 = vpack.c.bf16 %v503_v3, %v390_v32  ;;  %387 = vst [vmem:[%s1019_s1 + $0xe4] sm:$0xf] %v73_v30 }
   0xa   :  { %v43_v18 = vpack.c.bf16 %v503_v3, %v41_v15  ;;  %372 = vst [vmem:[%s1019_s1 + $0x40] sm:$0xf] %v34_v16  ;;  %v88_v36 = vpack.c.bf16 %v503_v3, %v392_v33  ;;  %v400_v43 = vld [vmem:[%s1018_s0 + $0x1d0] sm:$0xff]  ;;  %389 = vst [vmem:[%s1019_s1 + $0x44] sm:$0xf] %v78_v34  ;;  %v412_v55 = vld [vmem:[%s1018_s0 + $0x218] sm:$0xff] }
   0xb   :  { %374 = vst [vmem:[%s1019_s1 + $0xa0] sm:$0xf] %v39_v17  ;;  %v402_v44 = vld [vmem:[%s1018_s0 + $0x110] sm:$0xff]  ;;  %391 = vst [vmem:[%s1019_s1 + $0xa4] sm:$0xf] %v83_v35  ;;  %v108_v46 = vpack.c.bf16 %v503_v3, %v400_v43  ;;  %v414_v56 = vld [vmem:[%s1018_s0 + $0x158] sm:$0xff]  ;;  %v138_v58 = vpack.c.bf16 %v503_v3, %v412_v55 }
   0xc   :  { %375 = vst [vmem:[%s1019_s1 + $0x100] sm:$0xf] %v43_v18  ;;  %v404_v45 = vld [vmem:[%s1018_s0 + $0x50] sm:$0xff]  ;;  %393 = vst [vmem:[%s1019_s1 + $0x104] sm:$0xf] %v88_v36  ;;  %v113_v47 = vpack.c.bf16 %v503_v3, %v402_v44  ;;  %v416_v57 = vld [vmem:[%s1018_s0 + $0x98] sm:$0xff]  ;;  %v143_v59 = vpack.c.bf16 %v503_v3, %v414_v56 }
   0xd   :  { %v118_v48 = vpack.c.bf16 %v503_v3, %v404_v45  ;;  %v406_v49 = vld [vmem:[%s1018_s0 + $0x190] sm:$0xff]  ;;  %395 = vst [vmem:[%s1019_s1 + $0x8] sm:$0xf] %v93_v40  ;;  %397 = vst [vmem:[%s1019_s1 + $0x68] sm:$0xf] %v98_v41  ;;  %v148_v60 = vpack.c.bf16 %v503_v3, %v416_v57  ;;  %v418_v61 = vld [vmem:[%s1018_s0 + $0x1d8] sm:$0xff] }
   0xe   :  { %v408_v50 = vld [vmem:[%s1018_s0 + $0xd0] sm:$0xff]  ;;  %399 = vst [vmem:[%s1019_s1 + $0xc8] sm:$0xf] %v103_v42  ;;  %v123_v52 = vpack.c.bf16 %v503_v3, %v406_v49  ;;  %401 = vst [vmem:[%s1019_s1 + $0x28] sm:$0xf] %v108_v46  ;;  %v420_v62 = vld [vmem:[%s1018_s0 + $0x118] sm:$0xff]  ;;  %v153_v0 = vpack.c.bf16 %v503_v3, %v418_v61 }
   0xf   :  { %v410_v51 = vld [vmem:[%s1018_s0 + $0x10] sm:$0xff]  ;;  %v128_v53 = vpack.c.bf16 %v503_v3, %v408_v50  ;;  %403 = vst [vmem:[%s1019_s1 + $0x88] sm:$0xf] %v113_v47  ;;  %405 = vst [vmem:[%s1019_s1 + $0xe8] sm:$0xf] %v118_v48  ;;  %v422_v63 = vld [vmem:[%s1018_s0 + $0x58] sm:$0xff]  ;;  %v158_v1 = vpack.c.bf16 %v503_v3, %v420_v62 }
  0x10   :  { %v133_v54 = vpack.c.bf16 %v503_v3, %v410_v51  ;;  %407 = vst [vmem:[%s1019_s1 + $0x48] sm:$0xf] %v123_v52  ;;  %v163_v2 = vpack.c.bf16 %v503_v3, %v422_v63  ;;  %v424_v4 = vld [vmem:[%s1018_s0 + $0x198] sm:$0xff]  ;;  %413 = vst [vmem:[%s1019_s1 + $0xc] sm:$0xf] %v138_v58  ;;  %v430_v10 = vld [vmem:[%s1018_s0 + $0x220] sm:$0xff] }
  0x11   :  { %409 = vst [vmem:[%s1019_s1 + $0xa8] sm:$0xf] %v128_v53  ;;  %v426_v5 = vld [vmem:[%s1018_s0 + $0xd8] sm:$0xff]  ;;  %415 = vst [vmem:[%s1019_s1 + $0x6c] sm:$0xf] %v143_v59  ;;  %v168_v7 = vpack.c.bf16 %v503_v3, %v424_v4  ;;  %v432_v11 = vld [vmem:[%s1018_s0 + $0x160] sm:$0xff]  ;;  %v183_v13 = vpack.c.bf16 %v503_v3, %v430_v10 }
  0x12   :  { %411 = vst [vmem:[%s1019_s1 + $0x108] sm:$0xf] %v133_v54  ;;  %v428_v6 = vld [vmem:[%s1018_s0 + $0x18] sm:$0xff]  ;;  %417 = vst [vmem:[%s1019_s1 + $0xcc] sm:$0xf] %v148_v60  ;;  %v173_v8 = vpack.c.bf16 %v503_v3, %v426_v5  ;;  %v434_v12 = vld [vmem:[%s1018_s0 + $0xa0] sm:$0xff]  ;;  %v188_v14 = vpack.c.bf16 %v503_v3, %v432_v11 }
  0x13   :  { %v178_v9 = vpack.c.bf16 %v503_v3, %v428_v6  ;;  %419 = vst [vmem:[%s1019_s1 + $0x2c] sm:$0xf] %v153_v0  ;;  %421 = vst [vmem:[%s1019_s1 + $0x8c] sm:$0xf] %v158_v1  ;;  %v193_v15 = vpack.c.bf16 %v503_v3, %v434_v12  ;;  %v436_v16 = vld [vmem:[%s1018_s0 + $0x1e0] sm:$0xff]  ;;  %v448_v28 = vld [vmem:[%s1018_s0 + $0x228] sm:$0xff] }
  0x14   :  { %423 = vst [vmem:[%s1019_s1 + $0xec] sm:$0xf] %v163_v2  ;;  %v438_v17 = vld [vmem:[%s1018_s0 + $0x120] sm:$0xff]  ;;  %425 = vst [vmem:[%s1019_s1 + $0x4c] sm:$0xf] %v168_v7  ;;  %v198_v19 = vpack.c.bf16 %v503_v3, %v436_v16  ;;  %v450_v29 = vld [vmem:[%s1018_s0 + $0x168] sm:$0xff]  ;;  %v228_v31 = vpack.c.bf16 %v503_v3, %v448_v28 }
  0x15   :  { %v440_v18 = vld [vmem:[%s1018_s0 + $0x60] sm:$0xff]  ;;  %427 = vst [vmem:[%s1019_s1 + $0xac] sm:$0xf] %v173_v8  ;;  %429 = vst [vmem:[%s1019_s1 + $0x10c] sm:$0xf] %v178_v9  ;;  %v203_v20 = vpack.c.bf16 %v503_v3, %v438_v17  ;;  %v452_v30 = vld [vmem:[%s1018_s0 + $0xa8] sm:$0xff]  ;;  %v233_v32 = vpack.c.bf16 %v503_v3, %v450_v29 }
  0x16   :  { %v208_v21 = vpack.c.bf16 %v503_v3, %v440_v18  ;;  %v442_v22 = vld [vmem:[%s1018_s0 + $0x1a0] sm:$0xff]  ;;  %431 = vst [vmem:[%s1019_s1 + $0x10] sm:$0xf] %v183_v13  ;;  %433 = vst [vmem:[%s1019_s1 + $0x70] sm:$0xf] %v188_v14  ;;  %v238_v33 = vpack.c.bf16 %v503_v3, %v452_v30  ;;  %v454_v34 = vld [vmem:[%s1018_s0 + $0x1e8] sm:$0xff] }
  0x17   :  { %v444_v23 = vld [vmem:[%s1018_s0 + $0xe0] sm:$0xff]  ;;  %435 = vst [vmem:[%s1019_s1 + $0xd0] sm:$0xf] %v193_v15  ;;  %v213_v25 = vpack.c.bf16 %v503_v3, %v442_v22  ;;  %437 = vst [vmem:[%s1019_s1 + $0x30] sm:$0xf] %v198_v19  ;;  %v456_v35 = vld [vmem:[%s1018_s0 + $0x128] sm:$0xff]  ;;  %v243_v37 = vpack.c.bf16 %v503_v3, %v454_v34 }
  0x18   :  { %v446_v24 = vld [vmem:[%s1018_s0 + $0x20] sm:$0xff]  ;;  %v218_v26 = vpack.c.bf16 %v503_v3, %v444_v23  ;;  %439 = vst [vmem:[%s1019_s1 + $0x90] sm:$0xf] %v203_v20  ;;  %441 = vst [vmem:[%s1019_s1 + $0xf0] sm:$0xf] %v208_v21  ;;  %v458_v36 = vld [vmem:[%s1018_s0 + $0x68] sm:$0xff]  ;;  %v248_v38 = vpack.c.bf16 %v503_v3, %v456_v35 }
  0x19   :  { %v223_v27 = vpack.c.bf16 %v503_v3, %v446_v24  ;;  %443 = vst [vmem:[%s1019_s1 + $0x50] sm:$0xf] %v213_v25  ;;  %v253_v39 = vpack.c.bf16 %v503_v3, %v458_v36  ;;  %v460_v40 = vld [vmem:[%s1018_s0 + $0x1a8] sm:$0xff]  ;;  %449 = vst [vmem:[%s1019_s1 + $0x14] sm:$0xf] %v228_v31  ;;  %v466_v46 = vld [vmem:[%s1018_s0 + $0x230] sm:$0xff] }
  0x1a   :  { %445 = vst [vmem:[%s1019_s1 + $0xb0] sm:$0xf] %v218_v26  ;;  %v462_v41 = vld [vmem:[%s1018_s0 + $0xe8] sm:$0xff]  ;;  %451 = vst [vmem:[%s1019_s1 + $0x74] sm:$0xf] %v233_v32  ;;  %v258_v43 = vpack.c.bf16 %v503_v3, %v460_v40  ;;  %v468_v47 = vld [vmem:[%s1018_s0 + $0x170] sm:$0xff]  ;;  %v273_v49 = vpack.c.bf16 %v503_v3, %v466_v46 }
  0x1b   :  { %447 = vst [vmem:[%s1019_s1 + $0x110] sm:$0xf] %v223_v27  ;;  %v464_v42 = vld [vmem:[%s1018_s0 + $0x28] sm:$0xff]  ;;  %453 = vst [vmem:[%s1019_s1 + $0xd4] sm:$0xf] %v238_v33  ;;  %v263_v44 = vpack.c.bf16 %v503_v3, %v462_v41  ;;  %v470_v48 = vld [vmem:[%s1018_s0 + $0xb0] sm:$0xff]  ;;  %v278_v50 = vpack.c.bf16 %v503_v3, %v468_v47 }
  0x1c   :  { %v268_v45 = vpack.c.bf16 %v503_v3, %v464_v42  ;;  %455 = vst [vmem:[%s1019_s1 + $0x34] sm:$0xf] %v243_v37  ;;  %457 = vst [vmem:[%s1019_s1 + $0x94] sm:$0xf] %v248_v38  ;;  %v283_v51 = vpack.c.bf16 %v503_v3, %v470_v48  ;;  %v472_v52 = vld [vmem:[%s1018_s0 + $0x1f0] sm:$0xff]  ;;  %v484_v0 = vld [vmem:[%s1018_s0 + $0x238] sm:$0xff] }
  0x1d   :  { %459 = vst [vmem:[%s1019_s1 + $0xf4] sm:$0xf] %v253_v39  ;;  %v474_v53 = vld [vmem:[%s1018_s0 + $0x130] sm:$0xff]  ;;  %461 = vst [vmem:[%s1019_s1 + $0x54] sm:$0xf] %v258_v43  ;;  %v288_v55 = vpack.c.bf16 %v503_v3, %v472_v52  ;;  %v486_v1 = vld [vmem:[%s1018_s0 + $0x178] sm:$0xff]  ;;  %v318_v4 = vpack.c.bf16 %v503_v3, %v484_v0 }
  0x1e   :  { %v476_v54 = vld [vmem:[%s1018_s0 + $0x70] sm:$0xff]  ;;  %463 = vst [vmem:[%s1019_s1 + $0xb4] sm:$0xf] %v263_v44  ;;  %465 = vst [vmem:[%s1019_s1 + $0x114] sm:$0xf] %v268_v45  ;;  %v293_v56 = vpack.c.bf16 %v503_v3, %v474_v53  ;;  %v488_v2 = vld [vmem:[%s1018_s0 + $0xb8] sm:$0xff]  ;;  %v323_v5 = vpack.c.bf16 %v503_v3, %v486_v1 }
  0x1f   :  { %v298_v57 = vpack.c.bf16 %v503_v3, %v476_v54  ;;  %v478_v58 = vld [vmem:[%s1018_s0 + $0x1b0] sm:$0xff]  ;;  %467 = vst [vmem:[%s1019_s1 + $0x18] sm:$0xf] %v273_v49  ;;  %469 = vst [vmem:[%s1019_s1 + $0x78] sm:$0xf] %v278_v50  ;;  %v328_v6 = vpack.c.bf16 %v503_v3, %v488_v2  ;;  %v490_v7 = vld [vmem:[%s1018_s0 + $0x1f8] sm:$0xff] }
  0x20   :  { %v480_v59 = vld [vmem:[%s1018_s0 + $0xf0] sm:$0xff]  ;;  %471 = vst [vmem:[%s1019_s1 + $0xd8] sm:$0xf] %v283_v51  ;;  %v303_v61 = vpack.c.bf16 %v503_v3, %v478_v58  ;;  %473 = vst [vmem:[%s1019_s1 + $0x38] sm:$0xf] %v288_v55  ;;  %v492_v8 = vld [vmem:[%s1018_s0 + $0x138] sm:$0xff]  ;;  %v333_v10 = vpack.c.bf16 %v503_v3, %v490_v7 }
  0x21   :  { %v482_v60 = vld [vmem:[%s1018_s0 + $0x30] sm:$0xff]  ;;  %v308_v62 = vpack.c.bf16 %v503_v3, %v480_v59  ;;  %475 = vst [vmem:[%s1019_s1 + $0x98] sm:$0xf] %v293_v56  ;;  %477 = vst [vmem:[%s1019_s1 + $0xf8] sm:$0xf] %v298_v57  ;;  %v494_v9 = vld [vmem:[%s1018_s0 + $0x78] sm:$0xff]  ;;  %v338_v11 = vpack.c.bf16 %v503_v3, %v492_v8 }
  0x22   :  { %v313_v63 = vpack.c.bf16 %v503_v3, %v482_v60  ;;  %479 = vst [vmem:[%s1019_s1 + $0x58] sm:$0xf] %v303_v61  ;;  %v343_v12 = vpack.c.bf16 %v503_v3, %v494_v9  ;;  %v496_v13 = vld [vmem:[%s1018_s0 + $0x1b8] sm:$0xff]  ;;  %485 = vst [vmem:[%s1019_s1 + $0x1c] sm:$0xf] %v318_v4 }
  0x23   :  { %481 = vst [vmem:[%s1019_s1 + $0xb8] sm:$0xf] %v308_v62  ;;  %v498_v14 = vld [vmem:[%s1018_s0 + $0xf8] sm:$0xff]  ;;  %487 = vst [vmem:[%s1019_s1 + $0x7c] sm:$0xf] %v323_v5  ;;  %v348_v16 = vpack.c.bf16 %v503_v3, %v496_v13 }
  0x24   :  { %483 = vst [vmem:[%s1019_s1 + $0x118] sm:$0xf] %v313_v63  ;;  %v500_v15 = vld [vmem:[%s1018_s0 + $0x38] sm:$0xff]  ;;  %489 = vst [vmem:[%s1019_s1 + $0xdc] sm:$0xf] %v328_v6  ;;  %v353_v17 = vpack.c.bf16 %v503_v3, %v498_v14 }
  0x25   :  { %v358_v3 = vpack.c.bf16 %v503_v3, %v500_v15  ;;  %491 = vst [vmem:[%s1019_s1 + $0x3c] sm:$0xf] %v333_v10  ;;  %493 = vst [vmem:[%s1019_s1 + $0x9c] sm:$0xf] %v338_v11 }
  0x26   :  { %495 = vst [vmem:[%s1019_s1 + $0xfc] sm:$0xf] %v343_v12  ;;  %497 = vst [vmem:[%s1019_s1 + $0x5c] sm:$0xf] %v348_v16 }
  0x27   :  { %499 = vst [vmem:[%s1019_s1 + $0xbc] sm:$0xf] %v353_v17  ;;  %501 = vst [vmem:[%s1019_s1 + $0x11c] sm:$0xf] %v358_v3 }

// kernel: reverse
= control target key start
LH: loop header
LB: loop body
LE: loop exit
PB: predicated region body
PF: predicated region fallthrough
CT: control target
= control target key end

     0   :  { %v251_v3 = vmov 0.0   ;;  %s514_s0 = inlined_call_operand.vmem [shape: f32[64,32,3,3], index: 0, kind: input, shape index: {}]   ;;  %s515_s1 = inlined_call_operand.vmem [shape: bf16[64,32,3,3], index: 1, kind: output, shape index: {}]  }
   0x1   :  { %v180_v0 = vld [vmem:[%s514_s0 + $0x100] sm:$0xff]  ;;  %v196_v19 = vld [vmem:[%s514_s0 + $0x108] sm:$0xff]  ;;  %v214_v37 = vld [vmem:[%s514_s0 + $0x110] sm:$0xff] }
   0x2   :  { %v181_v1 = vld [vmem:[%s514_s0 + $0xa0] sm:$0xff]  ;;  %v4_v4 = vpack.c.bf16 %v251_v3, %v180_v0  ;;  %v198_v20 = vld [vmem:[%s514_s0 + $0xa8] sm:$0xff]  ;;  %v48_v22 = vpack.c.bf16 %v251_v3, %v196_v19  ;;  %v216_v38 = vld [vmem:[%s514_s0 + $0xb0] sm:$0xff]  ;;  %v93_v40 = vpack.c.bf16 %v251_v3, %v214_v37 }
   0x3   :  { %v183_v2 = vld [vmem:[%s514_s0 + $0x40] sm:$0xff]  ;;  %v9_v5 = vpack.c.bf16 %v251_v3, %v181_v1  ;;  %v200_v21 = vld [vmem:[%s514_s0 + $0x48] sm:$0xff]  ;;  %v53_v23 = vpack.c.bf16 %v251_v3, %v198_v20  ;;  %v218_v39 = vld [vmem:[%s514_s0 + $0x50] sm:$0xff]  ;;  %v98_v41 = vpack.c.bf16 %v251_v3, %v216_v38 }
   0x4   :  { %v14_v6 = vpack.c.bf16 %v251_v3, %v183_v2  ;;  %v185_v7 = vld [vmem:[%s514_s0 + $0xe0] sm:$0xff]  ;;  %5 = vst [vmem:[%s515_s1] sm:$0xf] %v4_v4  ;;  %v58_v24 = vpack.c.bf16 %v251_v3, %v200_v21  ;;  %v202_v25 = vld [vmem:[%s514_s0 + $0xe8] sm:$0xff]  ;;  %197 = vst [vmem:[%s515_s1 + $0x4] sm:$0xf] %v48_v22  ;;  %v103_v42 = vpack.c.bf16 %v251_v3, %v218_v39 }
   0x5   :  { %v187_v8 = vld [vmem:[%s514_s0 + $0x80] sm:$0xff]  ;;  %v19_v10 = vpack.c.bf16 %v251_v3, %v185_v7  ;;  %182 = vst [vmem:[%s515_s1 + $0x30] sm:$0xf] %v9_v5  ;;  %v204_v26 = vld [vmem:[%s514_s0 + $0x88] sm:$0xff]  ;;  %v63_v28 = vpack.c.bf16 %v251_v3, %v202_v25  ;;  %199 = vst [vmem:[%s515_s1 + $0x34] sm:$0xf] %v53_v23 }
   0x6   :  { %v189_v9 = vld [vmem:[%s514_s0 + $0x20] sm:$0xff]  ;;  %v24_v11 = vpack.c.bf16 %v251_v3, %v187_v8  ;;  %184 = vst [vmem:[%s515_s1 + $0x60] sm:$0xf] %v14_v6  ;;  %v206_v27 = vld [vmem:[%s514_s0 + $0x28] sm:$0xff]  ;;  %v68_v29 = vpack.c.bf16 %v251_v3, %v204_v26  ;;  %201 = vst [vmem:[%s515_s1 + $0x64] sm:$0xf] %v58_v24 }
   0x7   :  { %v29_v12 = vpack.c.bf16 %v251_v3, %v189_v9  ;;  %v191_v13 = vld [vmem:[%s514_s0 + $0xc0] sm:$0xff]  ;;  %186 = vst [vmem:[%s515_s1 + $0x10] sm:$0xf] %v19_v10  ;;  %v73_v30 = vpack.c.bf16 %v251_v3, %v206_v27  ;;  %v208_v31 = vld [vmem:[%s514_s0 + $0xc8] sm:$0xff]  ;;  %203 = vst [vmem:[%s515_s1 + $0x14] sm:$0xf] %v63_v28 }
   0x8   :  { %v193_v14 = vld [vmem:[%s514_s0 + $0x60] sm:$0xff]  ;;  %v34_v16 = vpack.c.bf16 %v251_v3, %v191_v13  ;;  %188 = vst [vmem:[%s515_s1 + $0x40] sm:$0xf] %v24_v11  ;;  %v210_v32 = vld [vmem:[%s514_s0 + $0x68] sm:$0xff]  ;;  %v78_v34 = vpack.c.bf16 %v251_v3, %v208_v31  ;;  %205 = vst [vmem:[%s515_s1 + $0x44] sm:$0xf] %v68_v29 }
   0x9   :  { %v41_v15 = vld [vmem:[%s514_s0] sm:$0xff]  ;;  %v39_v17 = vpack.c.bf16 %v251_v3, %v193_v14  ;;  %190 = vst [vmem:[%s515_s1 + $0x70] sm:$0xf] %v29_v12  ;;  %v212_v33 = vld [vmem:[%s514_s0 + $0x8] sm:$0xff]  ;;  %v83_v35 = vpack.c.bf16 %v251_v3, %v210_v32  ;;  %207 = vst [vmem:[%s515_s1 + $0x74] sm:$0xf] %v73_v30 }
   0xa   :  { %v43_v18 = vpack.c.bf16 %v251_v3, %v41_v15  ;;  %192 = vst [vmem:[%s515_s1 + $0x20] sm:$0xf] %v34_v16  ;;  %v88_v36 = vpack.c.bf16 %v251_v3, %v212_v33  ;;  %v220_v43 = vld [vmem:[%s514_s0 + $0xf0] sm:$0xff]  ;;  %209 = vst [vmem:[%s515_s1 + $0x24] sm:$0xf] %v78_v34  ;;  %v232_v55 = vld [vmem:[%s514_s0 + $0x118] sm:$0xff] }
   0xb   :  { %194 = vst [vmem:[%s515_s1 + $0x50] sm:$0xf] %v39_v17  ;;  %v222_v44 = vld [vmem:[%s514_s0 + $0x90] sm:$0xff]  ;;  %211 = vst [vmem:[%s515_s1 + $0x54] sm:$0xf] %v83_v35  ;;  %v108_v46 = vpack.c.bf16 %v251_v3, %v220_v43  ;;  %v234_v56 = vld [vmem:[%s514_s0 + $0xb8] sm:$0xff]  ;;  %v138_v58 = vpack.c.bf16 %v251_v3, %v232_v55 }
   0xc   :  { %195 = vst [vmem:[%s515_s1 + $0x80] sm:$0xf] %v43_v18  ;;  %v224_v45 = vld [vmem:[%s514_s0 + $0x30] sm:$0xff]  ;;  %213 = vst [vmem:[%s515_s1 + $0x84] sm:$0xf] %v88_v36  ;;  %v113_v47 = vpack.c.bf16 %v251_v3, %v222_v44  ;;  %v236_v57 = vld [vmem:[%s514_s0 + $0x58] sm:$0xff]  ;;  %v143_v59 = vpack.c.bf16 %v251_v3, %v234_v56 }
   0xd   :  { %v118_v48 = vpack.c.bf16 %v251_v3, %v224_v45  ;;  %v226_v49 = vld [vmem:[%s514_s0 + $0xd0] sm:$0xff]  ;;  %215 = vst [vmem:[%s515_s1 + $0x8] sm:$0xf] %v93_v40  ;;  %217 = vst [vmem:[%s515_s1 + $0x38] sm:$0xf] %v98_v41  ;;  %v148_v60 = vpack.c.bf16 %v251_v3, %v236_v57  ;;  %v238_v61 = vld [vmem:[%s514_s0 + $0xf8] sm:$0xff] }
   0xe   :  { %v228_v50 = vld [vmem:[%s514_s0 + $0x70] sm:$0xff]  ;;  %219 = vst [vmem:[%s515_s1 + $0x68] sm:$0xf] %v103_v42  ;;  %v123_v52 = vpack.c.bf16 %v251_v3, %v226_v49  ;;  %221 = vst [vmem:[%s515_s1 + $0x18] sm:$0xf] %v108_v46  ;;  %v240_v62 = vld [vmem:[%s514_s0 + $0x98] sm:$0xff]  ;;  %v153_v0 = vpack.c.bf16 %v251_v3, %v238_v61 }
   0xf   :  { %v230_v51 = vld [vmem:[%s514_s0 + $0x10] sm:$0xff]  ;;  %v128_v53 = vpack.c.bf16 %v251_v3, %v228_v50  ;;  %223 = vst [vmem:[%s515_s1 + $0x48] sm:$0xf] %v113_v47  ;;  %225 = vst [vmem:[%s515_s1 + $0x78] sm:$0xf] %v118_v48  ;;  %v242_v63 = vld [vmem:[%s514_s0 + $0x38] sm:$0xff]  ;;  %v158_v1 = vpack.c.bf16 %v251_v3, %v240_v62 }
  0x10   :  { %v133_v54 = vpack.c.bf16 %v251_v3, %v230_v51  ;;  %227 = vst [vmem:[%s515_s1 + $0x28] sm:$0xf] %v123_v52  ;;  %v163_v2 = vpack.c.bf16 %v251_v3, %v242_v63  ;;  %v244_v4 = vld [vmem:[%s514_s0 + $0xd8] sm:$0xff]  ;;  %233 = vst [vmem:[%s515_s1 + $0xc] sm:$0xf] %v138_v58 }
  0x11   :  { %229 = vst [vmem:[%s515_s1 + $0x58] sm:$0xf] %v128_v53  ;;  %v246_v5 = vld [vmem:[%s514_s0 + $0x78] sm:$0xff]  ;;  %235 = vst [vmem:[%s515_s1 + $0x3c] sm:$0xf] %v143_v59  ;;  %v168_v7 = vpack.c.bf16 %v251_v3, %v244_v4 }
  0x12   :  { %231 = vst [vmem:[%s515_s1 + $0x88] sm:$0xf] %v133_v54  ;;  %v248_v6 = vld [vmem:[%s514_s0 + $0x18] sm:$0xff]  ;;  %237 = vst [vmem:[%s515_s1 + $0x6c] sm:$0xf] %v148_v60  ;;  %v173_v8 = vpack.c.bf16 %v251_v3, %v246_v5 }
  0x13   :  { %v178_v3 = vpack.c.bf16 %v251_v3, %v248_v6  ;;  %239 = vst [vmem:[%s515_s1 + $0x1c] sm:$0xf] %v153_v0  ;;  %241 = vst [vmem:[%s515_s1 + $0x4c] sm:$0xf] %v158_v1 }
  0x14   :  { %243 = vst [vmem:[%s515_s1 + $0x7c] sm:$0xf] %v163_v2  ;;  %245 = vst [vmem:[%s515_s1 + $0x2c] sm:$0xf] %v168_v7 }
  0x15   :  { %247 = vst [vmem:[%s515_s1 + $0x5c] sm:$0xf] %v173_v8  ;;  %249 = vst [vmem:[%s515_s1 + $0x8c] sm:$0xf] %v178_v3 }

// kernel: style_loss_forward.5
= control target key start
LH: loop header
LB: loop body
LE: loop exit
PB: predicated region body
PF: predicated region fallthrough
CT: control target
= control target key end

     0   :  { %s771_s9 = smov 0   ;;  %s773_s10 = smov 0   ;;  %s913_s0 = inlined_call_operand.vmem [shape: bf16[2,128,128], index: 0, kind: input, shape index: {}]   ;;  %s914_s1 = inlined_call_operand.vmem [shape: bf16[2,128,128], index: 1, kind: input, shape index: {}]   ;;  %s915_s2 = inlined_call_operand.vmem [shape: f32[2,128,128], index: 2, kind: output, shape index: {}]  }
   0x1   :  { %s775_s11 = smov 0  }
   0x2 LB: > { %s24_s12 = sadd.s32 1, %s750_s10  ;;  %p615_p0 = scmp.ge.s32.totalorder %s754_s11, 1  ;;  %s754_s11 = sphi %s775_s11, %s12_s11   ;;  %s750_s10 = sphi %s773_s10, %s917_s10   ;;  %s746_s9 = sphi %s771_s9, %s916_s9  }
   0x3   : > { %p26_p1 = scmp.ge.s32.totalorder %s24_s12, 2  ;;  %p144_p2 = scmp.lt.s32.totalorder %s754_s11, 3 }
   0x5   : > { %s919_s12 = smov (%p26_p1, %s24_s12), 0  ;;  %p145_p3 = pnand %p615_p0, %p144_p2 }
   0x6   : > { %p177_p4 = scmp.lt.s32.totalorder (!%p145_p3), %s746_s9, 1 }
   0x7   : > { %148 = sbr.rel (%p145_p3) target bundleno = 311 (0x137), region = 28 }
   0xe   : > { %s921_s9 = smov (!%p177_p4, %s746_s9), 1 }
   0xf   : > { %s640_s13 = sshll.u32 %s921_s9, 6  ;;  %s642_s20 = sshll.u32 %s921_s9, 7 }
  0x10   : > { %s795_s16 = scalar_lea.vmem %s913_s0, %s640_s13  ;;  %s800_s19 = scalar_lea.vmem %s914_s1, %s640_s13 }
  0x11   : > { %v219_v0 = vld [vmem:[%s795_s16] sm:$0xf]  ;;  %v220_v1 = vld [vmem:[%s795_s16 + $0x4] sm:$0xf]  ;;  %v807_v5 = vld [vmem:[%s795_s16 + $0x8] sm:$0xf]  ;;  %s886_s23 = scalar_lea.vmem %s915_s2, %s642_s20 }
  0x12   : > { %v235_v2 = vld [vmem:[%s800_s19] sm:$0xf]  ;;  %v236_v3 = vld [vmem:[%s800_s19 + $0x4] sm:$0xf]  ;;  %v810_v6 = vld [vmem:[%s795_s16 + $0xc] sm:$0xf] }
  0x13   : > { %v283_v4 = vadd.bf16 %v235_v2, %v219_v0  ;;  %v267_v7 = vsub.bf16 %v219_v0, %v235_v2  ;;  %v284_v8 = vadd.bf16 %v236_v3, %v220_v1  ;;  %v813_v9 = vld [vmem:[%s800_s19 + $0x8] sm:$0xf]  ;;  %v816_v10 = vld [vmem:[%s800_s19 + $0xc] sm:$0xf]  ;;  %v268_v11 = vsub.bf16 %v220_v1, %v236_v3  ;;  %v823_v15 = vld [vmem:[%s795_s16 + $0x10] sm:$0xf] }
  0x14   : > { %v285_v12 = vadd.bf16 %v813_v9, %v807_v5  ;;  %v286_v13 = vadd.bf16 %v816_v10, %v810_v6  ;;  %v826_v17 = vld [vmem:[%s795_s16 + $0x14] sm:$0xf]  ;;  %v829_v18 = vld [vmem:[%s800_s19 + $0x10] sm:$0xf]  ;;  %v227_v21 = vld [vmem:[%s795_s16 + $0x20] sm:$0xf]  ;;  %v269_v62 = vsub.bf16 %v807_v5, %v813_v9  ;;  %v270_v63 = vsub.bf16 %v810_v6, %v816_v10 }
  0x15   : > { %v630_v14 = vcombine.low %v283_v4, %v284_v8  ;;  %v832_v19 = vld [vmem:[%s800_s19 + $0x14] sm:$0xf]  ;;  %v622_v20 = vcombine.low %v267_v7, %v268_v11  ;;  %v243_v22 = vld [vmem:[%s800_s19 + $0x20] sm:$0xf]  ;;  %v287_v24 = vadd.bf16 %v829_v18, %v823_v15  ;;  %v228_v26 = vld [vmem:[%s795_s16 + $0x24] sm:$0xf]  ;;  %v271_v2 = vsub.bf16 %v823_v15, %v829_v18 }
  0x16   : > { %v631_v16 = vcombine.low %v285_v12, %v286_v13  ;;  %v275_v23 = vsub.bf16 %v227_v21, %v243_v22  ;;  %v288_v25 = vadd.bf16 %v832_v19, %v826_v17  ;;  %v244_v27 = vld [vmem:[%s800_s19 + $0x24] sm:$0xf]  ;;  %v843_v31 = vld [vmem:[%s795_s16 + $0x18] sm:$0xf]  ;;  %v846_v32 = vld [vmem:[%s795_s16 + $0x1c] sm:$0xf]  ;;  %v291_v38 = vadd.bf16 %v243_v22, %v227_v21 }
  0x17   : > { %659 = vmatprep.subr.bf16.mxu0 %v630_v14  ;;  %691 = vmatprep.subr.bf16.mxu1 %v630_v14  ;;  %v276_v28 = vsub.bf16 %v228_v26, %v244_v27  ;;  %v849_v33 = vld [vmem:[%s800_s19 + $0x18] sm:$0xf]  ;;  %v852_v34 = vld [vmem:[%s800_s19 + $0x1c] sm:$0xf]  ;;  %v292_v39 = vadd.bf16 %v244_v27, %v228_v26  ;;  %v229_v41 = vld [vmem:[%s795_s16 + $0x28] sm:$0xf]  ;;  %v272_v3 = vsub.bf16 %v826_v17, %v832_v19 }
  0x18   : > { %660 = vmatpush3.bf16.xpose.msra.mxu0 %v630_v14  ;;  %699 = vmatpush3.bf16.xpose.msra.mxu1 %v630_v14  ;;  %v632_v30 = vcombine.low %v287_v24, %v288_v25  ;;  %v289_v35 = vadd.bf16 %v849_v33, %v843_v31  ;;  %v290_v36 = vadd.bf16 %v852_v34, %v846_v32  ;;  %v230_v42 = vld [vmem:[%s795_s16 + $0x2c] sm:$0xf]  ;;  %v245_v43 = vld [vmem:[%s800_s19 + $0x28] sm:$0xf]  ;;  %v231_v48 = vld [vmem:[%s795_s16 + $0x30] sm:$0xf] }
  0x19   : > { %661 = vmatprep.subr.bf16.mxu0 %v631_v16  ;;  %692 = vmatprep.subr.bf16.mxu1 %v631_v16  ;;  %v626_v29 = vcombine.low %v275_v23, %v276_v28  ;;  %v634_v40 = vcombine.low %v291_v38, %v292_v39  ;;  %v246_v44 = vld [vmem:[%s800_s19 + $0x2c] sm:$0xf]  ;;  %v293_v45 = vadd.bf16 %v245_v43, %v229_v41  ;;  %v232_v49 = vld [vmem:[%s795_s16 + $0x34] sm:$0xf]  ;;  %v247_v50 = vld [vmem:[%s800_s19 + $0x30] sm:$0xf] }
  0x1a   : > { %675 = vmatprep.mubr.bf16.mxu0 %v622_v20  ;;  %v633_v37 = vcombine.low %v289_v35, %v290_v36  ;;  %v294_v46 = vadd.bf16 %v246_v44, %v230_v42  ;;  %v248_v51 = vld [vmem:[%s800_s19 + $0x34] sm:$0xf]  ;;  %v295_v52 = vadd.bf16 %v247_v50, %v231_v48  ;;  %v233_v55 = vld [vmem:[%s795_s16 + $0x38] sm:$0xf]  ;;  %v234_v56 = vld [vmem:[%s795_s16 + $0x3c] sm:$0xf]  ;;  %v277_v0 = vsub.bf16 %v229_v41, %v245_v43 }
  0x1b   : > { %683 = vmatprep.mubr.bf16.mxu1 %v626_v29  ;;  %v296_v53 = vadd.bf16 %v248_v51, %v232_v49  ;;  %v249_v57 = vld [vmem:[%s800_s19 + $0x38] sm:$0xf]  ;;  %v250_v58 = vld [vmem:[%s800_s19 + $0x3c] sm:$0xf]  ;;  %v278_v1 = vsub.bf16 %v230_v42, %v246_v44  ;;  %v279_v4 = vsub.bf16 %v231_v48, %v247_v50  ;;  %v280_v7 = vsub.bf16 %v232_v49, %v248_v51 }
  0x1c   : > { %v635_v47 = vcombine.low %v293_v45, %v294_v46  ;;  %v297_v59 = vadd.bf16 %v249_v57, %v233_v55  ;;  %v298_v60 = vadd.bf16 %v250_v58, %v234_v56  ;;  %v623_v8 = vcombine.low %v269_v62, %v270_v63 }
  0x1d   : > { %v636_v54 = vcombine.low %v295_v52, %v296_v53  ;;  %v627_v11 = vcombine.low %v277_v0, %v278_v1  ;;  %v624_v12 = vcombine.low %v271_v2, %v272_v3  ;;  %v628_v5 = vcombine.low %v279_v4, %v280_v7 }
  0x1e   : > { %v637_v61 = vcombine.low %v297_v59, %v298_v60  ;;  %v273_v6 = vsub.bf16 %v843_v31, %v849_v33  ;;  %v274_v9 = vsub.bf16 %v846_v32, %v852_v34  ;;  %v281_v10 = vsub.bf16 %v233_v55, %v249_v57 }
  0x1f   : > { %v282_v13 = vsub.bf16 %v234_v56, %v250_v58 }
  0x20   : > { %662 = vmatpush3.bf16.xpose.msra.mxu0 %v631_v16  ;;  %700 = vmatpush3.bf16.xpose.msra.mxu1 %v631_v16  ;;  %v625_v14 = vcombine.low %v273_v6, %v274_v9 }
  0x21   : > { %663 = vmatprep.subr.bf16.mxu0 %v632_v30  ;;  %693 = vmatprep.subr.bf16.mxu1 %v632_v30  ;;  %v629_v15 = vcombine.low %v281_v10, %v282_v13 }
  0x28   : > { %664 = vmatpush3.bf16.xpose.msra.mxu0 %v632_v30  ;;  %701 = vmatpush3.bf16.xpose.msra.mxu1 %v632_v30 }
  0x29   : > { %665 = vmatprep.subr.bf16.mxu0 %v633_v37  ;;  %694 = vmatprep.subr.bf16.mxu1 %v633_v37 }
  0x30   : > { %666 = vmatpush3.bf16.xpose.msra.mxu0 %v633_v37  ;;  %702 = vmatpush3.bf16.xpose.msra.mxu1 %v633_v37 }
  0x31   : > { %667 = vmatprep.subr.bf16.mxu0 %v634_v40  ;;  %695 = vmatprep.subr.bf16.mxu1 %v634_v40 }
  0x38   : > { %668 = vmatpush3.bf16.xpose.msra.mxu0 %v634_v40  ;;  %703 = vmatpush3.bf16.xpose.msra.mxu1 %v634_v40 }
  0x39   : > { %669 = vmatprep.subr.bf16.mxu0 %v635_v47  ;;  %696 = vmatprep.subr.bf16.mxu1 %v635_v47 }
  0x40   : > { %670 = vmatpush3.bf16.xpose.msra.mxu0 %v635_v47  ;;  %704 = vmatpush3.bf16.xpose.msra.mxu1 %v635_v47 }
  0x41   : > { %671 = vmatprep.subr.bf16.mxu0 %v636_v54  ;;  %697 = vmatprep.subr.bf16.mxu1 %v636_v54 }
  0x48   : > { %672 = vmatpush3.bf16.xpose.msra.mxu0 %v636_v54  ;;  %705 = vmatpush3.bf16.xpose.msra.mxu1 %v636_v54 }
  0x49   : > { %673 = vmatprep.subr.bf16.mxu0 %v637_v61  ;;  %698 = vmatprep.subr.bf16.mxu1 %v637_v61 }
  0x50   : > { %674 = vmatpush3.bf16.xpose.msra.mxu0 %v637_v61  ;;  %706 = vmatpush3.bf16.xpose.msra.mxu1 %v637_v61 }
  0x57   : > { %676 = vmatmul.mubr.bf16.vlgmr.msra.gmra.mrb[0].mxu0 %v623_v8  ;;  %684 = vmatmul.mubr.bf16.vlgmr.msra.gmra.mrb[0].mxu1 %v627_v11 }
  0x58   : > { %679 = vmatprep.mubr.bf16.mxu0 %v624_v12  ;;  %687 = vmatprep.mubr.bf16.mxu1 %v628_v5 }
  0x5f   : > { %680 = vmatmul.mubr.bf16.gmra.mrb[4].mxu0 %v625_v14  ;;  %688 = vmatmul.mubr.bf16.gmra.mrb[4].mxu1 %v629_v15 }
 0x12a   : > { %v677_v16 = vpop.f32.mrb[0].mxu0  ;;  %v685_v17 = vpop.f32.mrb[0].mxu1 }
 0x12b   : > { %v429_v18 = vpop.f32.mrb[1].mxu0  ;;  %v461_v19 = vpop.f32.mrb[1].mxu1  ;;  %510 = vst [vmem:[%s886_s23 + $0x10] sm:$0xff] %v677_v16  ;;  %518 = vst [vmem:[%s886_s23 + $0x50] sm:$0xff] %v685_v17 }
 0x12c   : > { %v678_v20 = vpop.f32.mrb[2].mxu0  ;;  %v686_v21 = vpop.f32.mrb[2].mxu1  ;;  %508 = vst [vmem:[%s886_s23] sm:$0xff] %v429_v18  ;;  %516 = vst [vmem:[%s886_s23 + $0x40] sm:$0xff] %v461_v19 }
 0x12d   : > { %v432_v22 = vpop.f32.mrb[3].mxu0  ;;  %v464_v23 = vpop.f32.mrb[3].mxu1  ;;  %511 = vst [vmem:[%s886_s23 + $0x18] sm:$0xff] %v678_v20  ;;  %519 = vst [vmem:[%s886_s23 + $0x58] sm:$0xff] %v686_v21 }
 0x12e   : > { %509 = vst [vmem:[%s886_s23 + $0x8] sm:$0xff] %v432_v22  ;;  %517 = vst [vmem:[%s886_s23 + $0x48] sm:$0xff] %v464_v23 }
 0x132   : > { %v681_v24 = vpop.f32.mrb[4].mxu0  ;;  %v689_v25 = vpop.f32.mrb[4].mxu1 }
 0x133   : > { %v445_v26 = vpop.f32.mrb[5].mxu0  ;;  %v477_v27 = vpop.f32.mrb[5].mxu1  ;;  %514 = vst [vmem:[%s886_s23 + $0x30] sm:$0xff] %v681_v24  ;;  %522 = vst [vmem:[%s886_s23 + $0x70] sm:$0xff] %v689_v25 }
 0x134   : > { %v682_v28 = vpop.f32.mrb[6].mxu0  ;;  %v690_v29 = vpop.f32.mrb[6].mxu1  ;;  %512 = vst [vmem:[%s886_s23 + $0x20] sm:$0xff] %v445_v26  ;;  %520 = vst [vmem:[%s886_s23 + $0x60] sm:$0xff] %v477_v27 }
 0x135   : > { %v448_v30 = vpop.f32.mrb[7].mxu0  ;;  %v480_v31 = vpop.f32.mrb[7].mxu1  ;;  %515 = vst [vmem:[%s886_s23 + $0x38] sm:$0xff] %v682_v28  ;;  %523 = vst [vmem:[%s886_s23 + $0x78] sm:$0xff] %v690_v29 }
 0x136   : > { %513 = vst [vmem:[%s886_s23 + $0x28] sm:$0xff] %v448_v30  ;;  %521 = vst [vmem:[%s886_s23 + $0x68] sm:$0xff] %v480_v31 }
 0x137 PF: > { %s12_s11 = sadd.s32 1, %s754_s11   ;;  %s916_s9 = smov %s750_s10 }
 0x138   : > { %p9_p5 = scmp.ge.s32.totalorder %s12_s11, 4   ;;  %s917_s10 = smov %s919_s12 }
 0x13a   :  { %11 = sbr.rel (!%p9_p5) target bundleno = 2 (0x2), region = 65 }

// kernel: style_loss_forward.3
= control target key start
LH: loop header
LB: loop body
LE: loop exit
PB: predicated region body
PF: predicated region fallthrough
CT: control target
= control target key end

     0   :  { %s494_s9 = smov 0   ;;  %s496_s10 = smov 0   ;;  %s552_s0 = inlined_call_operand.vmem [shape: bf16[2,32,128], index: 0, kind: input, shape index: {}]   ;;  %s553_s1 = inlined_call_operand.vmem [shape: bf16[2,32,128], index: 1, kind: input, shape index: {}]   ;;  %s554_s2 = inlined_call_operand.vmem [shape: f32[2,32,32], index: 2, kind: output, shape index: {}]  }
   0x1   :  { %s498_s11 = smov 0  }
   0x2 LB: > { %s24_s12 = sadd.s32 1, %s472_s10  ;;  %p401_p0 = scmp.ge.s32.totalorder %s476_s11, 1  ;;  %s476_s11 = sphi %s498_s11, %s12_s11   ;;  %s472_s10 = sphi %s496_s10, %s556_s10   ;;  %s468_s9 = sphi %s494_s9, %s555_s9  }
   0x3   : > { %p26_p1 = scmp.ge.s32.totalorder %s24_s12, 2  ;;  %p144_p2 = scmp.lt.s32.totalorder %s476_s11, 3 }
   0x5   : > { %s558_s12 = smov (%p26_p1, %s24_s12), 0  ;;  %p145_p3 = pnand %p401_p0, %p144_p2 }
   0x6   : > { %p177_p4 = scmp.lt.s32.totalorder (!%p145_p3), %s468_s9, 1  ;;  %vm203_vm0 = vcmask (!%p145_p3), 261120   ;;  %v478_v8 = vmov (!%p145_p3), 0.0  }
   0x7   : > { %148 = sbr.rel (%p145_p3) target bundleno = 257 (0x101), region = 28 }
   0xe   : > { %s560_s9 = smov (!%p177_p4, %s468_s9), 1 }
   0xf   : > { %s414_s13 = sshll.u32 %s560_s9, 4  ;;  %s416_s14 = sshll.u32 %s560_s9, 5 }
  0x10   : > { %s184_s17 = scalar_lea.vmem %s552_s0, %s414_s13  ;;  %s192_s20 = scalar_lea.vmem %s553_s1, %s414_s13 }
  0x11   : > { %s521_s23 = scalar_lea.vmem %s554_s2, %s416_s14  ;;  %v208_v0 = vld [vmem:[%s184_s17] sm:$0xf]  ;;  %v209_v1 = vld [vmem:[%s184_s17 + $0x4] sm:$0xf]  ;;  %v210_v5 = vld [vmem:[%s184_s17 + $0x8] sm:$0xf] }
  0x12   : > { %v212_v2 = vld [vmem:[%s192_s20] sm:$0xf]  ;;  %v213_v3 = vld [vmem:[%s192_s20 + $0x4] sm:$0xf]  ;;  %v211_v6 = vld [vmem:[%s184_s17 + $0xc] sm:$0xf] }
  0x13   : > { %v224_v4 = vadd.bf16 %v212_v2, %v208_v0  ;;  %v220_v7 = vsub.bf16 %v208_v0, %v212_v2  ;;  %206 = vst.msk [vmem:[%s521_s23 + $0x10] sm:$0xff] %vm203_vm0, %v478_v8  ;;  %204 = vst.msk [vmem:[%s521_s23] sm:$0xff] %vm203_vm0, %v478_v8  ;;  %v225_v9 = vadd.bf16 %v213_v3, %v209_v1  ;;  %v214_v10 = vld [vmem:[%s192_s20 + $0x8] sm:$0xf]  ;;  %v215_v11 = vld [vmem:[%s192_s20 + $0xc] sm:$0xf] }
  0x14   : > { %205 = vst.msk [vmem:[%s521_s23 + $0x8] sm:$0xff] %vm203_vm0, %v478_v8  ;;  %207 = vst.msk [vmem:[%s521_s23 + $0x18] sm:$0xff] %vm203_vm0, %v478_v8  ;;  %v221_v12 = vsub.bf16 %v209_v1, %v213_v3  ;;  %v226_v13 = vadd.bf16 %v214_v10, %v210_v5  ;;  %v227_v14 = vadd.bf16 %v215_v11, %v211_v6 }
  0x15   : > { %v410_v15 = vcombine.low %v224_v4, %v225_v9  ;;  %v222_v18 = vsub.bf16 %v210_v5, %v214_v10  ;;  %v223_v19 = vsub.bf16 %v211_v6, %v215_v11 }
  0x16   : > { %v408_v16 = vcombine.low %v220_v7, %v221_v12  ;;  %v411_v17 = vcombine.low %v226_v13, %v227_v14 }
  0x17   : > { %421 = vmatprep.subr.bf16.mxu0 %v410_v15  ;;  %v409_v20 = vcombine.low %v222_v18, %v223_v19 }
  0x18   : > { %425 = vmatprep.mubr.bf16.mxu0 %v408_v16  ;;  %422 = vmatpush3.bf16.xpose.msra.mxu0 %v410_v15 }
  0x19   : > { %423 = vmatprep.subr.bf16.mxu0 %v411_v17 }
  0x1a   : > { %v218_v21 = vld [vmem:[%s521_s23 + $0x10] sm:$0xff]  ;;  %v216_v22 = vld [vmem:[%s521_s23] sm:$0xff] }
  0x1b   : > { %v219_v24 = vld [vmem:[%s521_s23 + $0x18] sm:$0xff]  ;;  %v217_v27 = vld [vmem:[%s521_s23 + $0x8] sm:$0xff] }
  0x20   : > { %424 = vmatpush3.bf16.xpose.msra.mxu0 %v411_v17 }
  0x27   : > { %426 = vmatmul.mubr.bf16.vlgmr.msra.gmra.mrb[0].mxu0 %v409_v20 }
  0xfa   : > { %v427_v23 = vpop.f32.mrb[0].mxu0 }
  0xfb   : > { %v303_v25 = vadd.f32 %v427_v23, %v218_v21  ;;  %v286_v26 = vpop.f32.mrb[1].mxu0 }
  0xfc   : > { %v301_v28 = vadd.f32 %v286_v26, %v216_v22  ;;  %v428_v29 = vpop.f32.mrb[2].mxu0 }
  0xfd   : > { %308 = vst.msk [vmem:[%s521_s23 + $0x10] sm:$0xff] %vm203_vm0, %v303_v25  ;;  %v304_v30 = vadd.f32 %v428_v29, %v219_v24  ;;  %v289_v31 = vpop.f32.mrb[3].mxu0 }
  0xfe   : > { %306 = vst.msk [vmem:[%s521_s23] sm:$0xff] %vm203_vm0, %v301_v28  ;;  %v302_v32 = vadd.f32 %v289_v31, %v217_v27 }
  0xff   : > { %309 = vst.msk [vmem:[%s521_s23 + $0x18] sm:$0xff] %vm203_vm0, %v304_v30 }
 0x100   : > { %307 = vst.msk [vmem:[%s521_s23 + $0x8] sm:$0xff] %vm203_vm0, %v302_v32 }
 0x101 PF: > { %s12_s11 = sadd.s32 1, %s476_s11   ;;  %s555_s9 = smov %s472_s10 }
 0x102   : > { %p9_p5 = scmp.ge.s32.totalorder %s12_s11, 4   ;;  %s556_s10 = smov %s558_s12 }
 0x104   :  { %11 = sbr.rel (!%p9_p5) target bundleno = 2 (0x2), region = 65 }

</bundles_post_ra>
